<compile_context>
chip_gen: v6e
topology: v6e:2x2x1
jax: 0.10.0
libtpu: 0.0.40
codegen_flags: <defaults>
</compile_context>

<pallas_src>
import jax
import jax.numpy as jnp
from jax import lax
from jax.experimental import pallas as pl
from jax.experimental.pallas import tpu as pltpu

SELU_ALPHA = 1.6732632423543772
SELU_SCALE = 1.0507009873554805


def _round_up(n, m):
    return ((n + m - 1) // m) * m


def _cdiv(a, b):
    return (a + b - 1) // b


def _recip(x):
    # EUP approximate reciprocal + one Newton-Raphson refinement: keeps the
    # expensive part on the otherwise-idle EUP slot while retaining ~f32
    # accuracy (needed for the 1e-5 correctness check).
    r = pl.reciprocal(x, approx=True)
    return r * (2.0 - x * r)


def _classifier_a_kernel(x_ref, w1t_ref, b1_ref, w2t_ref, b2_ref, out_ref):
    # Feature-major layout: every activation is [features, TM]; the 128-lane
    # axis carries the batch tile (dense vregs, unmasked stores, MXU N = TM).
    x = x_ref[...]                                            # [TM, n_in]

    # hid_t[h, m] = sum_k w1t[h, k] * x[m, k]   (canonical NT / "q @ k.T")
    hid = lax.dot_general(
        w1t_ref[...], x, (((1,), (1,)), ((), ())),
        preferred_element_type=jnp.float32,
    ) + b1_ref[...]                                           # [H, TM]

    # SELU; exp argument clamped so the discarded branch never overflows.
    selu = SELU_SCALE * jnp.where(
        hid > 0.0, hid, SELU_ALPHA * (jnp.exp(jnp.minimum(hid, 0.0)) - 1.0)
    )

    logits = jnp.dot(
        w2t_ref[...], selu, preferred_element_type=jnp.float32
    ) + b2_ref[...]                                           # [O, TM]

    # Softmax over the feature (sublane) axis, then +1e-16 and renormalize.
    m = jnp.max(logits, axis=0, keepdims=True)
    e = jnp.exp(logits - m)
    p = e * _recip(jnp.sum(e, axis=0, keepdims=True))
    p = p + 1e-16
    p = p * _recip(jnp.sum(p, axis=0, keepdims=True))

    out_ref[...] = p.astype(out_ref.dtype)


def _choose_tile(n_rows, n_in, n_hidden, n_out,
                 target_rows=16384, vmem_budget_bytes=16 << 20):
    """Pick the batch-tile size: as large as the budget allows, balanced
    across grid steps so padding never approaches a full tile."""
    # Bytes of VMEM per batch row: double-buffered x and out tiles plus a few
    # feature-major f32 intermediates (hid / selu / logits / exp / p).
    per_row = 4 * (2 * n_in + 2 * n_out + 6 * max(n_hidden, n_out))
    cap = max(128, (vmem_budget_bytes // per_row) // 128 * 128)
    tm = min(target_rows, cap)
    steps = max(1, _cdiv(n_rows, tm))
    tm = min(_round_up(_cdiv(n_rows, steps), 128), cap)
    return tm


def classifier_a_forward(x, params, target_rows=16384):
    """classifier_A forward. x: [..., n_in] -> probabilities [..., n_out]."""
    w1, b1, w2, b2 = params["w1"], params["b1"], params["w2"], params["b2"]
    n_in, n_hidden = w1.shape
    n_out = w2.shape[1]

    lead = x.shape[:-1]
    x2 = x.reshape(-1, n_in).astype(jnp.float32)
    n_rows = x2.shape[0]

    tm = _choose_tile(n_rows, n_in, n_hidden, n_out, target_rows=target_rows)
    steps = _cdiv(n_rows, tm)
    n_pad = steps * tm
    if n_pad != n_rows:
        x2 = jnp.pad(x2, ((0, n_pad - n_rows), (0, 0)))

    # Kernel-layout parameters (tiny, one-time host-side transposes).
    w1t = w1.T                        # [H, n_in]
    w2t = w2.T                        # [O, H]
    b1c = b1.reshape(n_hidden, 1)     # [H, 1]
    b2c = b2.reshape(n_out, 1)        # [O, 1]

    const2d = lambda shape: pl.BlockSpec(shape, lambda i: (0, 0))

    out_t = pl.pallas_call(
        _classifier_a_kernel,
        grid=(steps,),
        in_specs=[
            pl.BlockSpec((tm, n_in), lambda i: (i, 0)),   # x tile (pipelined)
            const2d(w1t.shape),                           # weights stay resident
            const2d(b1c.shape),
            const2d(w2t.shape),
            const2d(b2c.shape),
        ],
        # Lane-dense output: last dim is the batch tile -> unmasked stores.
        out_specs=pl.BlockSpec((n_out, tm), lambda i: (0, i)),
        out_shape=jax.ShapeDtypeStruct((n_out, n_pad), jnp.float32),
        compiler_params=pltpu.CompilerParams(
            # Independent batch steps; megacore sharding where available.
            # (No vmem_limit_bytes: footprint is a few MiB, default is ample,
            # and asking for all 64 MiB on v7x leaves no compiler headroom.)
            # TODO(synk): an explicit core_map / CORE_PARALLEL batch split
            # would guarantee use of both TensorCores on v7x.
            dimension_semantics=("parallel",),
        ),
    )(x2, w1t, b1c, w2t, b2c)

    out = out_t[:, :n_rows].T          # tiny [n_out, N] -> [N, n_out] transpose
    return out.reshape(lead + (n_out,))


def init_params(key, n_in, n_out):
    """Torch defaults: Linear(i, o) weight/bias ~ U(-1/sqrt(i), 1/sqrt(i)).
    Stored in natural JAX layout: w [in, out], b [out]. FCLayersA uses
    n_middle = n_output, so H == O == n_out."""
    ks = jax.random.split(key, 4)

    def lin(kw, kb, fan_in, fan_out):
        bound = 1.0 / jnp.sqrt(fan_in)
        w = jax.random.uniform(kw, (fan_in, fan_out), jnp.float32, -bound, bound)
        b = jax.random.uniform(kb, (fan_out,), jnp.float32, -bound, bound)
        return w, b

    w1, b1 = lin(ks[0], ks[1], n_in, n_out)    # to_hidden
    w2, b2 = lin(ks[2], ks[3], n_out, n_out)   # to_out
    return dict(w1=w1, b1=b1, w2=w2, b2=b2)


def reference_forward(x, p):
    hid = x @ p["w1"] + p["b1"]
    selu = SELU_SCALE * jnp.where(
        hid > 0, hid, SELU_ALPHA * (jnp.exp(jnp.minimum(hid, 0.0)) - 1.0)
    )
    logits = selu @ p["w2"] + p["b2"]
    probas = jax.nn.softmax(logits, axis=-1)
    probas = probas + 1e-16
    return probas / probas.sum(-1, keepdims=True)


if __name__ == "__main__":
    key = jax.random.PRNGKey(0)
    N, n_in, n_out = 16, 32, 10

    kx, kp = jax.random.split(key)
    x = jax.random.normal(kx, (N, n_in), jnp.float32)
    params = init_params(kp, n_in, n_out)

    probas = classifier_a_forward(x, params)
    jax.block_until_ready(probas)

    probas_ref = reference_forward(x, params)
    assert probas.shape == (N, n_out), "shape mismatch"
    assert jnp.allclose(probas, probas_ref, atol=1e-5), "probas mismatch"
    assert jnp.allclose(probas.sum(-1), 1.0, atol=1e-5), "rows do not sum to 1"

    print("KERNEL_OK")
</pallas_src>

<mosaic_0001>
module attributes {stable_mosaic.version = 11 : i64} {
  func.func @_classifier_a_kernel(%arg0: i32, %arg1: memref<128x32xf32, #tpu.memory_space<vmem>>, %arg2: memref<10x32xf32, #tpu.memory_space<vmem>>, %arg3: memref<10x1xf32, #tpu.memory_space<vmem>>, %arg4: memref<10x10xf32, #tpu.memory_space<vmem>>, %arg5: memref<10x1xf32, #tpu.memory_space<vmem>>, %arg6: memref<10x128xf32, #tpu.memory_space<vmem>>) attributes {dimension_semantics = [#tpu.dimension_semantics<parallel>], iteration_bounds = array<i64: 1>, scalar_prefetch = 0 : i64, scratch_operands = 0 : i64, tpu.core_type = #tpu.core_type<tc>, window_params = [{transform_indices = @transform_0, window_bounds = array<i64: 128, 32>}, {pipeline_mode = #tpu.pipeline_mode<synchronous>, transform_indices = @transform_1, window_bounds = array<i64: 10, 32>}, {pipeline_mode = #tpu.pipeline_mode<synchronous>, transform_indices = @transform_2, window_bounds = array<i64: 10, 1>}, {pipeline_mode = #tpu.pipeline_mode<synchronous>, transform_indices = @transform_3, window_bounds = array<i64: 10, 10>}, {pipeline_mode = #tpu.pipeline_mode<synchronous>, transform_indices = @transform_4, window_bounds = array<i64: 10, 1>}, {transform_indices = @transform_5, window_bounds = array<i64: 10, 128>}]} {
    %c0 = arith.constant 0 : index
    %c0_0 = arith.constant 0 : index
    %0 = vector.load %arg1[%c0, %c0_0] : memref<128x32xf32, #tpu.memory_space<vmem>>, vector<128x32xf32>
    %c0_1 = arith.constant 0 : index
    %c0_2 = arith.constant 0 : index
    %1 = vector.load %arg2[%c0_1, %c0_2] : memref<10x32xf32, #tpu.memory_space<vmem>>, vector<10x32xf32>
    %cst = arith.constant dense<0.000000e+00> : vector<10x128xf32>
    %2 = tpu.matmul %1, %0, %cst {dimension_numbers = #tpu.dot_dimension_numbers<[1], [1], [0], [0], [0, 0, 1, 0], [], []>} : vector<10x32xf32>, vector<128x32xf32>, vector<10x128xf32> -> vector<10x128xf32>
    %c0_3 = arith.constant 0 : index
    %c0_4 = arith.constant 0 : index
    %3 = vector.load %arg3[%c0_3, %c0_4] : memref<10x1xf32, #tpu.memory_space<vmem>>, vector<10x1xf32>
    %4 = vector.broadcast %3 : vector<10x1xf32> to vector<10x128xf32>
    %5 = arith.addf %2, %4 : vector<10x128xf32>
    %cst_5 = arith.constant 0.000000e+00 : f32
    %6 = vector.broadcast %cst_5 : f32 to vector<10x128xf32>
    %7 = arith.cmpf ogt, %5, %6 : vector<10x128xf32>
    %cst_6 = arith.constant 0.000000e+00 : f32
    %8 = vector.broadcast %cst_6 : f32 to vector<10x128xf32>
    %9 = arith.minimumf %5, %8 : vector<10x128xf32>
    %10 = math.exp %9 : vector<10x128xf32>
    %cst_7 = arith.constant 1.000000e+00 : f32
    %11 = vector.broadcast %cst_7 : f32 to vector<10x128xf32>
    %12 = arith.subf %10, %11 : vector<10x128xf32>
    %cst_8 = arith.constant 1.67326319 : f32
    %13 = vector.broadcast %cst_8 : f32 to vector<10x128xf32>
    %14 = arith.mulf %13, %12 : vector<10x128xf32>
    %15 = arith.select %7, %5, %14 : vector<10x128xi1>, vector<10x128xf32>
    %cst_9 = arith.constant 1.05070102 : f32
    %16 = vector.broadcast %cst_9 : f32 to vector<10x128xf32>
    %17 = arith.mulf %16, %15 : vector<10x128xf32>
    %c0_10 = arith.constant 0 : index
    %c0_11 = arith.constant 0 : index
    %18 = vector.load %arg4[%c0_10, %c0_11] : memref<10x10xf32, #tpu.memory_space<vmem>>, vector<10x10xf32>
    %cst_12 = arith.constant dense<0.000000e+00> : vector<10x128xf32>
    %19 = tpu.matmul %18, %17, %cst_12 {dimension_numbers = #tpu.dot_dimension_numbers<[1], [0], [0], [1], [0, 0, 1, 1], [], []>} : vector<10x10xf32>, vector<10x128xf32>, vector<10x128xf32> -> vector<10x128xf32>
    %c0_13 = arith.constant 0 : index
    %c0_14 = arith.constant 0 : index
    %20 = vector.load %arg5[%c0_13, %c0_14] : memref<10x1xf32, #tpu.memory_space<vmem>>, vector<10x1xf32>
    %21 = vector.broadcast %20 : vector<10x1xf32> to vector<10x128xf32>
    %22 = arith.addf %19, %21 : vector<10x128xf32>
    %cst_15 = arith.constant dense<0xFF800000> : vector<128xf32>
    %23 = vector.multi_reduction <maximumf>, %22, %cst_15 [0] : vector<10x128xf32> to vector<128xf32>
    %24 = vector.shape_cast %23 : vector<128xf32> to vector<1x128xf32>
    %25 = vector.broadcast %24 : vector<1x128xf32> to vector<10x128xf32>
    %26 = arith.subf %22, %25 : vector<10x128xf32>
    %27 = math.exp %26 : vector<10x128xf32>
    %cst_16 = arith.constant dense<0.000000e+00> : vector<128xf32>
    %28 = vector.multi_reduction <add>, %27, %cst_16 [0] : vector<10x128xf32> to vector<128xf32>
    %29 = vector.shape_cast %28 : vector<128xf32> to vector<1x128xf32>
    %30 = tpu.reciprocal %29 {approx = true} : vector<1x128xf32> -> vector<1x128xf32>
    %31 = arith.mulf %29, %30 : vector<1x128xf32>
    %cst_17 = arith.constant 2.000000e+00 : f32
    %32 = vector.broadcast %cst_17 : f32 to vector<1x128xf32>
    %33 = arith.subf %32, %31 : vector<1x128xf32>
    %34 = arith.mulf %30, %33 : vector<1x128xf32>
    %35 = vector.broadcast %34 : vector<1x128xf32> to vector<10x128xf32>
    %36 = arith.mulf %27, %35 : vector<10x128xf32>
    %cst_18 = arith.constant 1.000000e-16 : f32
    %37 = vector.broadcast %cst_18 : f32 to vector<10x128xf32>
    %38 = arith.addf %36, %37 : vector<10x128xf32>
    %cst_19 = arith.constant dense<0.000000e+00> : vector<128xf32>
    %39 = vector.multi_reduction <add>, %38, %cst_19 [0] : vector<10x128xf32> to vector<128xf32>
    %40 = vector.shape_cast %39 : vector<128xf32> to vector<1x128xf32>
    %41 = tpu.reciprocal %40 {approx = true} : vector<1x128xf32> -> vector<1x128xf32>
    %42 = arith.mulf %40, %41 : vector<1x128xf32>
    %cst_20 = arith.constant 2.000000e+00 : f32
    %43 = vector.broadcast %cst_20 : f32 to vector<1x128xf32>
    %44 = arith.subf %43, %42 : vector<1x128xf32>
    %45 = arith.mulf %41, %44 : vector<1x128xf32>
    %46 = vector.broadcast %45 : vector<1x128xf32> to vector<10x128xf32>
    %47 = arith.mulf %38, %46 : vector<10x128xf32>
    %c0_21 = arith.constant 0 : index
    %c0_22 = arith.constant 0 : index
    %48 = vector.load %arg6[%c0_21, %c0_22] : memref<10x128xf32, #tpu.memory_space<vmem>>, vector<10x128xf32>
    tpu.vector_store %arg6[%c0_21, %c0_22], %47 {strides = array<i32>} : memref<10x128xf32, #tpu.memory_space<vmem>>, vector<10x128xf32>,
    return
  }
  func.func @transform_0(%arg0: i32) -> (i32, i32) {
    %c0_i32 = arith.constant 0 : i32
    %c0_i32_0 = arith.constant 0 : i32
    return %arg0, %c0_i32 : i32, i32
  }
  func.func @transform_1(%arg0: i32) -> (i32, i32) {
    %c0_i32 = arith.constant 0 : i32
    %c0_i32_0 = arith.constant 0 : i32
    %c0_i32_1 = arith.constant 0 : i32
    return %c0_i32, %c0_i32_0 : i32, i32
  }
  func.func @transform_2(%arg0: i32) -> (i32, i32) {
    %c0_i32 = arith.constant 0 : i32
    %c0_i32_0 = arith.constant 0 : i32
    %c0_i32_1 = arith.constant 0 : i32
    return %c0_i32, %c0_i32_0 : i32, i32
  }
  func.func @transform_3(%arg0: i32) -> (i32, i32) {
    %c0_i32 = arith.constant 0 : i32
    %c0_i32_0 = arith.constant 0 : i32
    %c0_i32_1 = arith.constant 0 : i32
    return %c0_i32, %c0_i32_0 : i32, i32
  }
  func.func @transform_4(%arg0: i32) -> (i32, i32) {
    %c0_i32 = arith.constant 0 : i32
    %c0_i32_0 = arith.constant 0 : i32
    %c0_i32_1 = arith.constant 0 : i32
    return %c0_i32, %c0_i32_0 : i32, i32
  }
  func.func @transform_5(%arg0: i32) -> (i32, i32) {
    %c0_i32 = arith.constant 0 : i32
    %c0_i32_0 = arith.constant 0 : i32
    return %c0_i32, %arg0 : i32, i32
  }
}

</mosaic_0001>

<bundles_post_ra>
// kernel: tpu_custom_call.1
= control target key start
LH: loop header
LB: loop body
LE: loop exit
PB: predicated region body
PF: predicated region fallthrough
CT: control target
= control target key end

     0   :  { %vm51_vm0 = vcmask 261120   ;;  %v486_v2 = vmov 0   ;;  %s636_s0 = inlined_call_operand.vmem [shape: f32[128,32], index: 0, kind: input, shape index: {}]   ;;  %s637_s1 = inlined_call_operand.vmem [shape: f32[10,32], index: 1, kind: input, shape index: {}]   ;;  %s638_s2 = inlined_call_operand.vmem [shape: f32[10,1], index: 2, kind: input, shape index: {}]   ;;  %s639_s3 = inlined_call_operand.vmem [shape: f32[10,10], index: 3, kind: input, shape index: {}]   ;;  %s640_s4 = inlined_call_operand.vmem [shape: f32[10,1], index: 4, kind: input, shape index: {}]   ;;  %s641_s5 = inlined_call_operand.hbm [shape: f32[10,128], index: 5, kind: output, shape index: {}]  }
   0x1   :  { %v36_v0 = vld [vmem:[%s636_s0 + $0x78] sm:$0xff]  ;;  %v35_v1 = vld [vmem:[%s636_s0 + $0x70] sm:$0xff]  ;;  %450 = vset.pattern.permute.xlu0 %v486_v2  ;;  %451 = vset.pattern.permute.xlu1 %v486_v2  ;;  %v34_v3 = vld [vmem:[%s636_s0 + $0x68] sm:$0xff] }
   0x2   :  { %404 = vmatprep.subr.msk.mxu0 %vm51_vm0, %v36_v0  ;;  %v37_v4 = vld [vmem:[%s637_s1] sm:$0xff]  ;;  %v40_v5 = vld [vmem:[%s638_s2 + $0x8] sm:$0x3] }
   0x3   :  { %405 = vmatpush3.xpose.msk.msra.mxu0 %vm51_vm0, %v36_v0  ;;  %436 = vmatprep.mubr.msk.f32.mxu0 %vm51_vm0, %v37_v4 }
   0x4   :  { %406 = vmatprep.subr.msk.mxu0 %vm51_vm0, %v35_v1 }
   0x7   :  { %407 = vmatpush3.xpose.msk.msra.mxu0 %vm51_vm0, %v35_v1 }
   0x8   :  { %10 = vsyncpa [#allocation3], 0  ;;  %408 = vmatprep.subr.msk.mxu0 %vm51_vm0, %v34_v3  ;;  %48 = vperm.xlu0 %450, %v40_v5   ;;  %v33_v6 = vld [vmem:[%s636_s0 + $0x60] sm:$0xff]  ;;  %v32_v8 = vld [vmem:[%s636_s0 + $0x58] sm:$0xff]  ;;  %vm211_vm1 = vcmask 80896   ;;  %vm218_vm3 = vcmask 1041408  }
   0x9   :  { %v39_v7 = vld [vmem:[%s638_s2] sm:$0xff]  ;;  %v31_v9 = vld [vmem:[%s636_s0 + $0x50] sm:$0xff]  ;;  %v30_v10 = vld [vmem:[%s636_s0 + $0x48] sm:$0xff] }
   0xa   :  { %v29_v11 = vld [vmem:[%s636_s0 + $0x40] sm:$0xff]  ;;  %v28_v12 = vld [vmem:[%s636_s0 + $0x38] sm:$0xff]  ;;  %v27_v13 = vld [vmem:[%s636_s0 + $0x30] sm:$0xff] }
   0xb   :  { %409 = vmatpush3.xpose.msk.msra.mxu0 %vm51_vm0, %v34_v3  ;;  %v26_v14 = vld [vmem:[%s636_s0 + $0x28] sm:$0xff]  ;;  %v25_v15 = vld [vmem:[%s636_s0 + $0x20] sm:$0xff]  ;;  %v24_v16 = vld [vmem:[%s636_s0 + $0x18] sm:$0xff] }
   0xc   :  { %410 = vmatprep.subr.msk.mxu0 %vm51_vm0, %v33_v6  ;;  %43 = vperm.xlu0 %450, %v39_v7   ;;  %v23_v17 = vld [vmem:[%s636_s0 + $0x10] sm:$0xff]  ;;  %v22_v18 = vld [vmem:[%s636_s0 + $0x8] sm:$0xff]  ;;  %v21_v19 = vld [vmem:[%s636_s0] sm:$0xff] }
   0xd   :  { %v38_v20 = vld [vmem:[%s637_s1 + $0x8] sm:$0x3]  ;;  %v197_v21 = vld [vmem:[%s639_s3] sm:$0xff] }
   0xe   :  { %443 = vmatprep.mubr.msk.f32.mxu1 %vm211_vm1, %v197_v21  ;;  %v200_v22 = vld [vmem:[%s640_s4 + $0x8] sm:$0x3]  ;;  %v199_v23 = vld [vmem:[%s640_s4] sm:$0xff] }
   0xf   :  { %411 = vmatpush3.xpose.msk.msra.mxu0 %vm51_vm0, %v33_v6  ;;  %208 = vperm.xlu1 %451, %v200_v22   ;;  %v198_v44 = vld [vmem:[%s639_s3 + $0x8] sm:$0x3]  ;;  %s487_s3 = smov [#allocation2]  }
  0x10   :  { %412 = vmatprep.subr.msk.mxu0 %vm51_vm0, %v32_v8  ;;  %s348_s11 = sshll.u32 %s487_s3, 4  ;;  %s349_s11 = int_to_ptr.vmem [resolvable:$true] %s348_s11 }
  0x11   :  { %s464_s12 = scalar_lea.vmem %s349_s11, 256  ;;  %p469_p1 = scmp.lt.s32.totalorder %s349_s11, %s349_s11 }
  0x12   :  { %p465_p0 = scmp.ne.s32.totalorder %s349_s11, %s464_s12  ;;  %p470_p2 = scmp.lt.s32.totalorder %s464_s12, %s464_s12 }
  0x13   :  { %413 = vmatpush3.xpose.msk.msra.mxu0 %vm51_vm0, %v32_v8  ;;  %203 = vperm.xlu1 %451, %v199_v23  }
  0x14   :  { %414 = vmatprep.subr.msk.mxu0 %vm51_vm0, %v31_v9  ;;  %p471_p3 = por %p470_p2, %p469_p1 }
  0x16   :  { %p472_p4 = pnand %p471_p3, %p465_p0 }
  0x17   :  { %415 = vmatpush3.xpose.msk.msra.mxu0 %vm51_vm0, %v31_v9 }
  0x18   :  { %416 = vmatprep.subr.msk.mxu0 %vm51_vm0, %v30_v10 }
  0x1b   :  { %417 = vmatpush3.xpose.msk.msra.mxu0 %vm51_vm0, %v30_v10 }
  0x1c   :  { %418 = vmatprep.subr.msk.mxu0 %vm51_vm0, %v29_v11 }
  0x1f   :  { %419 = vmatpush3.xpose.msk.msra.mxu0 %vm51_vm0, %v29_v11 }
  0x20   :  { %420 = vmatprep.subr.msk.mxu0 %vm51_vm0, %v28_v12 }
  0x23   :  { %421 = vmatpush3.xpose.msk.msra.mxu0 %vm51_vm0, %v28_v12 }
  0x24   :  { %422 = vmatprep.subr.msk.mxu0 %vm51_vm0, %v27_v13 }
  0x27   :  { %423 = vmatpush3.xpose.msk.msra.mxu0 %vm51_vm0, %v27_v13 }
  0x28   :  { %424 = vmatprep.subr.msk.mxu0 %vm51_vm0, %v26_v14 }
  0x2b   :  { %425 = vmatpush3.xpose.msk.msra.mxu0 %vm51_vm0, %v26_v14 }
  0x2c   :  { %426 = vmatprep.subr.msk.mxu0 %vm51_vm0, %v25_v15 }
  0x2f   :  { %427 = vmatpush3.xpose.msk.msra.mxu0 %vm51_vm0, %v25_v15 }
  0x30   :  { %428 = vmatprep.subr.msk.mxu0 %vm51_vm0, %v24_v16 }
  0x33   :  { %429 = vmatpush3.xpose.msk.msra.mxu0 %vm51_vm0, %v24_v16 }
  0x34   :  { %430 = vmatprep.subr.msk.mxu0 %vm51_vm0, %v23_v17 }
  0x37   :  { %431 = vmatpush3.xpose.msk.msra.mxu0 %vm51_vm0, %v23_v17 }
  0x38   :  { %432 = vmatprep.subr.msk.mxu0 %vm51_vm0, %v22_v18 }
  0x3b   :  { %433 = vmatpush3.xpose.msk.msra.mxu0 %vm51_vm0, %v22_v18 }
  0x3c   :  { %434 = vmatprep.subr.msk.mxu0 %vm51_vm0, %v21_v19 }
  0x3f   :  { %435 = vmatpush3.xpose.msk.msra.mxu0 %vm51_vm0, %v21_v19 }
  0x42   :  { %437 = vmatmul.mubr.msk.f32.vlgmr.msra.gmra.mxu0 %vm51_vm0, %v38_v20 }
  0x83   :  { %v49_v24 = vpop.permute.xlu0 %48 }
  0x87   :  { %v44_v27 = vpop.permute.xlu0 %43 }
  0x8a   :  { %v209_v45 = vpop.permute.xlu1 %208 }
  0x8e   :  { %v204_v48 = vpop.permute.xlu1 %203 }
 0x102   :  { %v438_v25 = vpop.f32.mrf.mxu0 }
 0x103   :  { %v178_v26 = vadd.f32 %v438_v25, %v49_v24 }
 0x104   :  { %v172_v28 = vpop.f32.mrf.mxu0 }
 0x105   :  { %v184_v29 = vmin.f32 %v178_v26, 0.0  ;;  %v173_v30 = vadd.f32 %v172_v28, %v44_v27  ;;  %vm182_vm2 = vcmp.gt.f32.partialorder %v178_v26, 0.0 }
 0x107   :  { %v187_v31 = vmul.f32 1.442695, %v184_v29  ;;  %v183_v32 = vmin.f32 %v173_v30, 0.0  ;;  %vm181_vm4 = vcmp.gt.f32.partialorder %v173_v30, 0.0 }
 0x109   :  { %452 = vpow2.f32 %v187_v31  ;;  %v185_v33 = vmul.f32 1.442695, %v183_v32 }
 0x10b   :  { %454 = vpow2.f32 %v185_v33 }
 0x116   :  { %v453_v34 = vpop.eup %452 }
 0x117   :  { %v378_v35 = vadd.f32 -1.0, %v453_v34 }
 0x118   :  { %v455_v36 = vpop.eup %454 }
 0x119   :  { %v192_v37 = vmul.f32 1.6732632, %v378_v35  ;;  %v377_v38 = vadd.f32 -1.0, %v455_v36 }
 0x11b   :  { %v194_v39 = vsel %vm182_vm2, %v178_v26, %v192_v37  ;;  %v191_v40 = vmul.f32 1.6732632, %v377_v38 }
 0x11c   :  { %v196_v41 = vmul.f32 1.050701, %v194_v39 }
 0x11d   :  { %v193_v42 = vsel %vm181_vm4, %v173_v30, %v191_v40 }
 0x11e   :  { %439 = vmatprep.subr.msk.mxu1 %vm218_vm3, %v196_v41  ;;  %v195_v43 = vmul.f32 1.050701, %v193_v42 }
 0x11f   :  { %440 = vmatpush3.msk.msra.mxu1 %vm218_vm3, %v196_v41 }
 0x120   :  { %441 = vmatprep.subr.mxu1 %v195_v43 }
 0x121   :  { %442 = vmatpush3.msra.mxu1 %v195_v43 }
 0x122   :  { %444 = vmatmul.mubr.msk.f32.vlgmr.msra.gmra.mxu1 %vm211_vm1, %v198_v44 }
 0x1e2   :  { %v445_v46 = vpop.f32.mrf.mxu1 }
 0x1e3   :  { %v294_v47 = vadd.f32 %v445_v46, %v209_v45 }
 0x1e4   :  { %v288_v49 = vpop.f32.mrf.mxu1 }
 0x1e5   :  { %v297_v50 = vsel %vm218_vm3, %v294_v47, -inf  ;;  %v289_v51 = vadd.f32 %v288_v49, %v204_v48 }
 0x1e7   :  { %v298_v52 = vmax.f32 %v289_v51, %v297_v50 }
 0x1e9   :  { %v299_v53 = vrot.slane %v298_v52, 4 }
 0x1eb   :  { %v300_v54 = vmax.f32 %v298_v52, %v299_v53 }
 0x1ed   :  { %v301_v55 = vrot.slane %v300_v54, 2 }
 0x1ef   :  { %v302_v56 = vmax.f32 %v300_v54, %v301_v55 }
 0x1f1   :  { %v303_v57 = vrot.slane %v302_v56, 1 }
 0x1f3   :  { %v304_v58 = vmax.f32 %v302_v56, %v303_v57 }
 0x1f5   :  { %v305_v59 = vsub.f32 %v289_v51, %v304_v58  ;;  %v306_v60 = vsub.f32 %v294_v47, %v304_v58 }
 0x1f7   :  { %v307_v61 = vmul.f32 1.442695, %v305_v59  ;;  %v309_v62 = vmul.f32 1.442695, %v306_v60 }
 0x1f9   :  { %456 = vpow2.f32 %v307_v61 }
 0x1fa   :  { %458 = vpow2.f32 %v309_v62 }
 0x206   :  { %v457_v63 = vpop.eup %456 }
 0x207   :  { %v459_v0 = vpop.eup %458 }
 0x208   :  { %v311_v1 = vsel %vm218_vm3, %v459_v0, 0.0 }
 0x209   :  { %v312_v2 = vadd.f32 %v457_v63, %v311_v1 }
 0x20b   :  { %v313_v3 = vrot.slane %v312_v2, 4 }
 0x20d   :  { %v314_v4 = vadd.f32 %v313_v3, %v312_v2 }
 0x20f   :  { %v315_v5 = vrot.slane %v314_v4, 2 }
 0x211   :  { %v316_v6 = vadd.f32 %v315_v5, %v314_v4 }
 0x213   :  { %v317_v7 = vrot.slane %v316_v6, 1 }
 0x215   :  { %v318_v8 = vadd.f32 %v317_v7, %v316_v6 }
 0x217   :  { %460 = vrcp.f32 %v318_v8 }
 0x224   :  { %v461_v9 = vpop.eup %460 }
 0x225   :  { %v320_v10 = vmul.f32 %v461_v9, %v318_v8 }
 0x227   :  { %v321_v11 = vsub.f32 2.0, %v320_v10 }
 0x229   :  { %v322_v12 = vmul.f32 %v461_v9, %v321_v11 }
 0x22b   :  { %v323_v13 = vmul.f32 %v457_v63, %v322_v12  ;;  %v324_v14 = vmul.f32 %v459_v0, %v322_v12 }
 0x22d   :  { %v325_v15 = vadd.f32 1e-16, %v323_v13  ;;  %v326_v16 = vadd.f32 1e-16, %v324_v14 }
 0x22f   :  { %v327_v17 = vsel %vm218_vm3, %v326_v16, 0.0 }
 0x230   :  { %v328_v18 = vadd.f32 %v327_v17, %v325_v15 }
 0x232   :  { %v329_v19 = vrot.slane %v328_v18, 4 }
 0x234   :  { %v330_v20 = vadd.f32 %v329_v19, %v328_v18 }
 0x236   :  { %v331_v21 = vrot.slane %v330_v20, 2 }
 0x238   :  { %v332_v22 = vadd.f32 %v331_v21, %v330_v20 }
 0x23a   :  { %v333_v23 = vrot.slane %v332_v22, 1 }
 0x23c   :  { %v334_v24 = vadd.f32 %v333_v23, %v332_v22 }
 0x23e   :  { %462 = vrcp.f32 %v334_v24 }
 0x24b   :  { %v463_v25 = vpop.eup %462 }
 0x24c   :  { %v336_v26 = vmul.f32 %v463_v25, %v334_v24 }
 0x24e   :  { %v337_v27 = vsub.f32 2.0, %v336_v26 }
 0x250   :  { %v338_v28 = vmul.f32 %v463_v25, %v337_v27 }
 0x252   :  { %v339_v29 = vmul.f32 %v338_v28, %v325_v15  ;;  %v340_v30 = vmul.f32 %v338_v28, %v326_v16 }
 0x254   :  { %341 = vst [vmem:[#allocation2] sm:$0xff] %v339_v29  ;;  %342 = vst [vmem:[#allocation2 + $0x8] sm:$0x3] %v340_v30 }
 0x255   :  { %475 = shalt.err (!%p472_p4)
}
 0x256   :  { %s488_s13 = smov 128   ;;  %s489_s14 = smov 8  }
 0x257   :  { %354 = dma.vmem_to_hbm [thread:$0]  %s349_s11, 256, %s641_s5, [#allocation3], %s488_s13, %s488_s13, %s489_s14  }
 0x258   :  { %484 = dma.done.wait [#allocation3], 256  }
 0x259   :  { %485 = vsyncadd [#allocation3], 4294967040 }
 0x25a   :  { %358 = vsyncpa [#allocation3], 1 }

</bundles_post_ra>
